<compile_context>
chip_gen: v7x
topology: tpu7x:2x2x1
jax: 0.10.0
libtpu: 0.0.40
codegen_flags: <defaults>
</compile_context>

<pallas_src>
import math

import jax
import jax.numpy as jnp
from jax.experimental import pallas as pl
from jax.experimental.pallas import tpu as pltpu


_GELU_C = 0.7978845608028654  # sqrt(2/pi)


def _gelu(z):
    # BERT4Rec's custom GELU (tanh approximation).
    return 0.5 * z * (1.0 + jnp.tanh(_GELU_C * (z + 0.044715 * z * z * z)))


def _fused_kernel(x_ref, w_ref, b_ref, e_ref, ob_ref, o_ref, h_ref):
    # x : (tm, H)  f32      w : (H, H)  f32 (pre-transposed)   b : (1, H)  f32
    # e : (H, tn)  bf16     ob: (1, tn) f32
    # o : (tm, tn) f32      h_ref: (tm, H) bf16 VMEM scratch (lives across the vocab loop)
    @pl.when(pl.program_id(1) == 0)
    def _():
        # Transform + GELU once per row tile (x/w/b blocks are resident across j).
        z = jnp.dot(x_ref[...], w_ref[...],
                    preferred_element_type=jnp.float32) + b_ref[...]
        h_ref[...] = _gelu(z).astype(h_ref.dtype)

    acc = jnp.dot(h_ref[...], e_ref[...], preferred_element_type=jnp.float32)
    o_ref[...] = (acc + ob_ref[...]).astype(o_ref.dtype)


def _round_up(x, m):
    return (x + m - 1) // m * m


def bert4rec_transform_forward(x, transform_w, transform_b, item_embedding, out_bias,
                               *, tm=None, tn=None, compute_dtype=jnp.bfloat16):
    """Pallas implementation of BERT4RecTransformLayer.forward.

    x:              (..., hidden)          BERT hidden states
    transform_w:    (hidden, hidden)       nn.Linear weight (applied as x @ W^T)
    transform_b:    (hidden,)              nn.Linear bias
    item_embedding: (voc_size, hidden)     embedding.weight (matmul uses its transpose)
    out_bias:       (voc_size,)
    returns:        (..., voc_size) float32
    """
    orig_shape = x.shape
    H = orig_shape[-1]
    V = item_embedding.shape[0]

    x2d = x.reshape(-1, H).astype(jnp.float32)
    M = x2d.shape[0]

    # ---- tile selection (large lane-dense tiles, capped at the padded problem size) ----
    if tm is None:
        tm = min(256, _round_up(M, 16))          # rows per MXU pass (mult. of 16 for bf16)
    if tn is None:
        tn = min(512, _round_up(V, 128))         # lane-dense vocab tile (multiple of 128)
    M_pad = _round_up(M, tm)
    N_pad = _round_up(V, tn)

    if M_pad != M:
        x2d = jnp.pad(x2d, ((0, M_pad - M), (0, 0)))

    w_t = jnp.asarray(transform_w, jnp.float32).T            # (H, H)
    b_t = jnp.asarray(transform_b, jnp.float32).reshape(1, H)

    # (H, V) bf16: single fused XLA transpose+convert; kernel tiles are lane-dense
    # with the contraction dim already in sublanes.
    e_t = jnp.asarray(item_embedding, jnp.float32).T.astype(compute_dtype)
    ob = jnp.asarray(out_bias, jnp.float32).reshape(1, V)
    if N_pad != V:
        e_t = jnp.pad(e_t, ((0, 0), (0, N_pad - V)))
        ob = jnp.pad(ob, ((0, 0), (0, N_pad - V)))

    grid = (M_pad // tm, N_pad // tn)            # rows outer, vocab inner (fastest)

    out = pl.pallas_call(
        _fused_kernel,
        out_shape=jax.ShapeDtypeStruct((M_pad, N_pad), jnp.float32),
        grid_spec=pltpu.PrefetchScalarGridSpec(
            num_scalar_prefetch=0,
            grid=grid,
            in_specs=[
                pl.BlockSpec((tm, H), lambda i, j: (i, 0)),   # x rows: resident across j
                pl.BlockSpec((H, H), lambda i, j: (0, 0)),    # transform weight: resident
                pl.BlockSpec((1, H), lambda i, j: (0, 0)),    # transform bias: resident
                pl.BlockSpec((H, tn), lambda i, j: (0, j)),   # embedding tile
                pl.BlockSpec((1, tn), lambda i, j: (0, j)),   # out-bias tile
            ],
            out_specs=pl.BlockSpec((tm, tn), lambda i, j: (i, j)),
            scratch_shapes=[pltpu.VMEM((tm, H), compute_dtype)],
        ),
        compiler_params=pltpu.CompilerParams(
            dimension_semantics=("parallel", "arbitrary"),
        ),
        cost_estimate=pl.CostEstimate(
            flops=2 * M_pad * H * (H + N_pad),
            transcendentals=M_pad * H,
            bytes_accessed=(M_pad * H * 4                              # x, read once
                            + H * H * 4 + H * 4                       # transform params
                            + (M_pad // tm) * (H * N_pad * 2 + N_pad * 4)  # E + bias re-reads
                            + M_pad * N_pad * 4),                     # output
        ),
    )(x2d, w_t, b_t, e_t, ob)

    out = out[:M, :V]
    return out.reshape(*orig_shape[:-1], V)


if __name__ == "__main__":
    # Small shapes consistent with the module: hidden=32, voc_size_items=1000,
    # input = BERT hidden states [batch=2, seq=8, hidden=32].
    batch, seq, hidden, voc_size = 2, 8, 32, 1000

    key = jax.random.PRNGKey(0)
    kx, kw, kb, ke, ko = jax.random.split(key, 5)

    x = jax.random.normal(kx, (batch, seq, hidden), dtype=jnp.float32)

    # nn.Linear(hidden, hidden) default init shapes.
    lin_bound = 1.0 / math.sqrt(hidden)
    transform_w = jax.random.uniform(kw, (hidden, hidden), minval=-lin_bound,
                                     maxval=lin_bound, dtype=jnp.float32)
    transform_b = jax.random.uniform(kb, (hidden,), minval=-lin_bound,
                                     maxval=lin_bound, dtype=jnp.float32)

    # Item-embedding weight (voc_size, hidden) and out_bias per _init_bias.
    item_embedding = jax.random.normal(ke, (voc_size, hidden),
                                       dtype=jnp.float32) / math.sqrt(hidden)
    bias_bound = 1.0 / math.sqrt(voc_size)
    out_bias = jax.random.uniform(ko, (voc_size,), minval=-bias_bound,
                                  maxval=bias_bound, dtype=jnp.float32)

    y = bert4rec_transform_forward(x, transform_w, transform_b, item_embedding, out_bias)
    y = jax.block_until_ready(y)

    # Pure-JAX f32 reference of the same forward pass.
    z = x @ transform_w.T + transform_b
    h_ref = 0.5 * z * (1.0 + jnp.tanh(_GELU_C * (z + 0.044715 * z ** 3)))
    y_ref = h_ref @ item_embedding.T + out_bias

    assert y.shape == (batch, seq, voc_size)
    # Output-projection operands are bf16 (f32 accumulate), so allow bf16-level tolerance.
    assert jnp.allclose(y, y_ref, atol=2e-2, rtol=2e-2)

    print("KERNEL_OK")
</pallas_src>

<mosaic_0001>
module attributes {stable_mosaic.version = 11 : i64} {
  func.func @_fused_kernel(%arg0: i32, %arg1: i32, %arg2: memref<16x32xf32, #tpu.memory_space<vmem>>, %arg3: memref<32x32xf32, #tpu.memory_space<vmem>>, %arg4: memref<1x32xf32, #tpu.memory_space<vmem>>, %arg5: memref<32x512xbf16, #tpu.memory_space<vmem>>, %arg6: memref<1x512xf32, #tpu.memory_space<vmem>>, %arg7: memref<16x512xf32, #tpu.memory_space<vmem>>, %arg8: memref<16x32xbf16, #tpu.memory_space<vmem>>) attributes {dimension_semantics = [#tpu.dimension_semantics<parallel>, #tpu.dimension_semantics<arbitrary>], iteration_bounds = array<i64: 1, 2>, scalar_prefetch = 0 : i64, scratch_operands = 1 : i64, tpu.core_type = #tpu.core_type<tc>, window_params = [{transform_indices = @transform_0, window_bounds = array<i64: 16, 32>}, {pipeline_mode = #tpu.pipeline_mode<synchronous>, transform_indices = @transform_1, window_bounds = array<i64: 32, 32>}, {pipeline_mode = #tpu.pipeline_mode<synchronous>, transform_indices = @transform_2, window_bounds = array<i64: 1, 32>}, {transform_indices = @transform_3, window_bounds = array<i64: 32, 512>}, {transform_indices = @transform_4, window_bounds = array<i64: 1, 512>}, {transform_indices = @transform_5, window_bounds = array<i64: 16, 512>}]} {
    %c0_i32 = arith.constant 0 : i32
    %0 = arith.cmpi eq, %arg1, %c0_i32 : i32
    %1 = arith.extui %0 : i1 to i32
    %c0_i32_0 = arith.constant 0 : i32
    %2 = arith.cmpi ne, %1, %c0_i32_0 : i32
    scf.if %2 {
      %c0_8 = arith.constant 0 : index
      %c0_9 = arith.constant 0 : index
      %10 = vector.load %arg2[%c0_8, %c0_9] : memref<16x32xf32, #tpu.memory_space<vmem>>, vector<16x32xf32>
      %c0_10 = arith.constant 0 : index
      %c0_11 = arith.constant 0 : index
      %11 = vector.load %arg3[%c0_10, %c0_11] : memref<32x32xf32, #tpu.memory_space<vmem>>, vector<32x32xf32>
      %cst_12 = arith.constant dense<0.000000e+00> : vector<16x32xf32>
      %12 = tpu.matmul %10, %11, %cst_12 {dimension_numbers = #tpu.dot_dimension_numbers<[1], [0], [0], [1], [0, 0, 1, 1], [], []>} : vector<16x32xf32>, vector<32x32xf32>, vector<16x32xf32> -> vector<16x32xf32>
      %c0_13 = arith.constant 0 : index
      %c0_14 = arith.constant 0 : index
      %13 = vector.load %arg4[%c0_13, %c0_14] : memref<1x32xf32, #tpu.memory_space<vmem>>, vector<1x32xf32>
      %14 = vector.broadcast %13 : vector<1x32xf32> to vector<16x32xf32>
      %15 = arith.addf %12, %14 : vector<16x32xf32>
      %cst_15 = arith.constant 5.000000e-01 : f32
      %16 = vector.broadcast %cst_15 : f32 to vector<16x32xf32>
      %17 = arith.mulf %16, %15 : vector<16x32xf32>
      %cst_16 = arith.constant 4.471500e-02 : f32
      %18 = vector.broadcast %cst_16 : f32 to vector<16x32xf32>
      %19 = arith.mulf %18, %15 : vector<16x32xf32>
      %20 = arith.mulf %19, %15 : vector<16x32xf32>
      %21 = arith.mulf %20, %15 : vector<16x32xf32>
      %22 = arith.addf %15, %21 : vector<16x32xf32>
      %cst_17 = arith.constant 0.797884583 : f32
      %23 = vector.broadcast %cst_17 : f32 to vector<16x32xf32>
      %24 = arith.mulf %23, %22 : vector<16x32xf32>
      %25 = math.tanh %24 : vector<16x32xf32>
      %cst_18 = arith.constant 1.000000e+00 : f32
      %26 = vector.broadcast %cst_18 : f32 to vector<16x32xf32>
      %27 = arith.addf %26, %25 : vector<16x32xf32>
      %28 = arith.mulf %17, %27 : vector<16x32xf32>
      %29 = arith.truncf %28 : vector<16x32xf32> to vector<16x32xbf16>
      %c0_19 = arith.constant 0 : index
      %c0_20 = arith.constant 0 : index
      %30 = vector.load %arg8[%c0_19, %c0_20] : memref<16x32xbf16, #tpu.memory_space<vmem>>, vector<16x32xbf16>
      tpu.vector_store %arg8[%c0_19, %c0_20], %29 {strides = array<i32>} : memref<16x32xbf16, #tpu.memory_space<vmem>>, vector<16x32xbf16>,
    } else {
    }
    %c0 = arith.constant 0 : index
    %c0_1 = arith.constant 0 : index
    %3 = vector.load %arg8[%c0, %c0_1] : memref<16x32xbf16, #tpu.memory_space<vmem>>, vector<16x32xbf16>
    %c0_2 = arith.constant 0 : index
    %c0_3 = arith.constant 0 : index
    %4 = vector.load %arg5[%c0_2, %c0_3] : memref<32x512xbf16, #tpu.memory_space<vmem>>, vector<32x512xbf16>
    %cst = arith.constant dense<0.000000e+00> : vector<16x512xf32>
    %5 = tpu.matmul %3, %4, %cst {dimension_numbers = #tpu.dot_dimension_numbers<[1], [0], [0], [1], [0, 0, 1, 1], [], []>} : vector<16x32xbf16>, vector<32x512xbf16>, vector<16x512xf32> -> vector<16x512xf32>
    %c0_4 = arith.constant 0 : index
    %c0_5 = arith.constant 0 : index
    %6 = vector.load %arg6[%c0_4, %c0_5] : memref<1x512xf32, #tpu.memory_space<vmem>>, vector<1x512xf32>
    %7 = vector.broadcast %6 : vector<1x512xf32> to vector<16x512xf32>
    %8 = arith.addf %5, %7 : vector<16x512xf32>
    %c0_6 = arith.constant 0 : index
    %c0_7 = arith.constant 0 : index
    %9 = vector.load %arg7[%c0_6, %c0_7] : memref<16x512xf32, #tpu.memory_space<vmem>>, vector<16x512xf32>
    tpu.vector_store %arg7[%c0_6, %c0_7], %8 {strides = array<i32>} : memref<16x512xf32, #tpu.memory_space<vmem>>, vector<16x512xf32>,
    return
  }
  func.func @transform_0(%arg0: i32, %arg1: i32) -> (i32, i32) {
    %c0_i32 = arith.constant 0 : i32
    %c0_i32_0 = arith.constant 0 : i32
    return %arg0, %c0_i32 : i32, i32
  }
  func.func @transform_1(%arg0: i32, %arg1: i32) -> (i32, i32) {
    %c0_i32 = arith.constant 0 : i32
    %c0_i32_0 = arith.constant 0 : i32
    %c0_i32_1 = arith.constant 0 : i32
    return %c0_i32, %c0_i32_0 : i32, i32
  }
  func.func @transform_2(%arg0: i32, %arg1: i32) -> (i32, i32) {
    %c0_i32 = arith.constant 0 : i32
    %c0_i32_0 = arith.constant 0 : i32
    %c0_i32_1 = arith.constant 0 : i32
    return %c0_i32, %c0_i32_0 : i32, i32
  }
  func.func @transform_3(%arg0: i32, %arg1: i32) -> (i32, i32) {
    %c0_i32 = arith.constant 0 : i32
    %c0_i32_0 = arith.constant 0 : i32
    return %c0_i32, %arg1 : i32, i32
  }
  func.func @transform_4(%arg0: i32, %arg1: i32) -> (i32, i32) {
    %c0_i32 = arith.constant 0 : i32
    %c0_i32_0 = arith.constant 0 : i32
    return %c0_i32, %arg1 : i32, i32
  }
  func.func @transform_5(%arg0: i32, %arg1: i32) -> (i32, i32) {
    %c0_i32 = arith.constant 0 : i32
    return %arg0, %arg1 : i32, i32
  }
}

</mosaic_0001>

<bundles_post_ra>
// kernel: tpu_custom_call.1
= control target key start
LH: loop header
LB: loop body
LE: loop exit
PB: predicated region body
PF: predicated region fallthrough
CT: control target
= control target key end

     0   :  { %10 = vsyncpa [#allocation4], 0  ;;  %s1426_s0 = inlined_call_operand.hbm [shape: f32[16,32], index: 0, kind: input, shape index: {}]   ;;  %s1427_s1 = inlined_call_operand.hbm [shape: f32[32,32], index: 1, kind: input, shape index: {}]   ;;  %s1428_s2 = inlined_call_operand.vmem [shape: f32[1,32], index: 2, kind: input, shape index: {}]   ;;  %s1429_s3 = inlined_call_operand.hbm [shape: bf16[32,1024], index: 3, kind: input, shape index: {}]   ;;  %s1430_s4 = inlined_call_operand.vmem [shape: f32[1,1024], index: 4, kind: input, shape index: {}]   ;;  %s1431_s5 = inlined_call_operand.hbm [shape: f32[16,1024], index: 5, kind: output, shape index: {}]  }
   0x1   :  { %11 = vsyncpa [#allocation7], 0 }
   0x2   :  { %12 = vsyncpa [#allocation5], 0 }
   0x3   :  { %14 = vsyncpa [#allocation5 + $0x1], 0  ;;  %s1125_s18 = smov 0   ;;  %s1127_s19 = smov 0  }
   0x4   :  { %s1129_s20 = smov 0   ;;  %s1131_s21 = smov 0  }
   0x5   :  { %s1133_s22 = smov 0   ;;  %s1135_s23 = smov 0  }
   0x6 LB: > { %s1156_s24 = sadd.s32 4294967295, %s1080_s23   ;;  %s736_s25 = sadd.s32 4294967294, %s1080_s23   ;;  %s1080_s23 = sphi %s1135_s23, %s20_s23   ;;  %s1076_s22 = sphi %s1133_s22, %s1458_s22   ;;  %s1072_s21 = sphi %s1131_s21, %s1457_s21   ;;  %s1068_s20 = sphi %s1129_s20, %s1456_s20   ;;  %s1064_s19 = sphi %s1127_s19, %s1455_s19   ;;  %s1060_s18 = sphi %s1125_s18, %s1454_s18  }
   0x7   : > { %p114_p0 = scmp.ne.s32.totalorder %s1068_s20, %s1064_s19  ;;  %p115_p1 = scmp.eq.s32.totalorder %s1080_s23, 0 }
   0x8   : > { %p120_p2 = scmp.ne.s32.totalorder %s1064_s19, %s1060_s18  ;;  %p1432_p3 = scmp.eq.s32.totalorder %s1156_s24, 0 }
   0x9   : > { %p172_p4 = scmp.eq.s32.totalorder %s1156_s24, 1  ;;  %p1167_p5 = por %p115_p1, %p114_p0 }
   0xa   : > { %p178_p6 = scmp.eq.s32.totalorder %s736_s25, 1  ;;  %p1173_p7 = por %p1432_p3, %p120_p2 }
   0xb   : > { %p1177_p8 = por %p172_p4, %p114_p0  ;;  %p737_p10 = scmp.ge.s32.totalorder %s1080_s23, 1 }
   0xc   : > { %s1437_s28 = scalar_select %p1173_p7, 1, 0 }
   0xd   : > { %s1438_s29 = scalar_select %p1177_p8, 1, 0 }
   0xe   : > { %p1181_p9 = por %p178_p6, %p120_p2  ;;  %p185_p11 = scmp.lt.s32.totalorder %s1080_s23, 3 }
   0xf   : > { %s1082_s7 = smov [#allocation3]   ;;  %p825_p1 = scmp.lt.s32.totalorder %s1080_s23, 2 }
  0x10   : > { %s1439_s30 = scalar_select %p1181_p9, 1, 0 }
  0x11   : > { %p1187_p12 = pnand %p737_p10, %p185_p11  ;;  %s200_s8 = sshll.u32 %s1082_s7, 4  ;;  %s1191_s8 = int_to_ptr.vmem [resolvable:$true] %s200_s8 }
  0x12   : > { %1440 = sst [smem:[#allocation14_spill]] %s1439_s30  ;;  %s1083_s10 = smov [#allocation6]  }
  0x13   : > { %p808_p13 = pneg %p1187_p12  ;;  %s213_s11 = sshll.u32 %s1083_s10, 4  ;;  %s1209_s11 = int_to_ptr.vmem [resolvable:$true] %s213_s11 }
  0x14   : > { %p1205_p4 = pnand %p825_p1, %p1167_p5  ;;  %s904_s15 = scalar_lea.hbm %s1426_s0, 256 }
  0x15   : > { %p1199_p2 = pnand %p808_p13, %p1432_p3  ;;  %p905_p6 = scmp.ne.s32.totalorder %s1426_s0, %s904_s15 }
  0x16   : > { %p911_p5 = scmp.lt.u32.totalorder %s904_s15, %s1426_s0 }
  0x17   : > { %p906_p10 = pneg %p1199_p2 }
  0x19   : > { %p907_p11 = pnand %p906_p10, %p905_p6 }
  0x1b   : > { %p908_p13 = pneg %p907_p11 }
  0x1d   : > { %p913_p1 = pnand %p911_p5, %p908_p13 }
  0x1f   : > { %916 = shalt.err (!%p913_p1)
}
  0x20   : > { %s917_s7 = scalar_lea.vmem %s1191_s8, 256  ;;  %p925_p8 = scmp.lt.s32.totalorder %s1191_s8, %s1191_s8 }
  0x21   : > { %p918_p0 = scmp.ne.s32.totalorder %s1191_s8, %s917_s7  ;;  %p926_p6 = scmp.lt.s32.totalorder %s917_s7, %s917_s7 }
  0x23   : > { %p920_p3 = pnand %p918_p0, %p906_p10  ;;  %p927_p11 = por %p926_p6, %p925_p8 }
  0x25   : > { %p921_p9 = pneg %p920_p3 }
  0x27   : > { %p928_p7 = pnand %p927_p11, %p921_p9 }
  0x29   : > { %931 = shalt.err (!%p928_p7)
}
  0x2a   : > { %s1084_s10 = smov 128   ;;  %s1085_s13 = smov 8  }
  0x2b   : > { %811 = dma.hbm_to_vmem [thread:$0]  (!%p1199_p2), %s1426_s0, 256, %s1191_s8, [#allocation4], %s1084_s10, %s1084_s10, %s1085_s13  }
  0x2c   : > { %s932_s25 = scalar_lea.hbm %s1427_s1, 512 }
  0x2d   : > { %p933_p3 = scmp.ne.s32.totalorder %s1427_s1, %s932_s25  ;;  %p939_p9 = scmp.lt.u32.totalorder %s932_s25, %s1427_s1 }
  0x2f   : > { %p935_p7 = pnand %p933_p3, %p906_p10 }
  0x31   : > { %p936_p8 = pneg %p935_p7 }
  0x33   : > { %p941_p0 = pnand %p939_p9, %p936_p8 }
  0x35   : > { %944 = shalt.err (!%p941_p0)
}
  0x36   : > { %s945_s8 = scalar_lea.vmem %s1209_s11, 512  ;;  %p953_p6 = scmp.lt.s32.totalorder %s1209_s11, %s1209_s11 }
  0x37   : > { %p946_p13 = scmp.ne.s32.totalorder %s1209_s11, %s945_s8  ;;  %p954_p11 = scmp.lt.s32.totalorder %s945_s8, %s945_s8 }
  0x39   : > { %p948_p5 = pnand %p946_p13, %p906_p10  ;;  %p955_p3 = por %p954_p11, %p953_p6 }
  0x3b   : > { %p949_p1 = pneg %p948_p5 }
  0x3d   : > { %p956_p7 = pnand %p955_p3, %p949_p1 }
  0x3f   : > { %959 = shalt.err (!%p956_p7)
}
  0x40   : > { %814 = dma.hbm_to_vmem [thread:$0]  (!%p1199_p2), %s1427_s1, 512, %s1209_s11, [#allocation7], %s1084_s10, %s1084_s10, %s1085_s13  }
  0x41   : > { %s29_s14 = sadd.s32 1, %s1076_s22  ;;  %s230_s15 = sand.u32 1, %s1080_s23  }
  0x42   : > { %p30_p10 = scmp.ge.s32.totalorder %s29_s14, 2  ;;  %s232_s16 = sand.u32 1, %s1068_s20  }
  0x43   : > { %s769_s17 = sshll.u32 %s1076_s22, 8  ;;  %s741_s9 = sshll.u32 %s232_s16, 6 }
  0x44   : > { %s1460_s14 = smov (%p30_p10, %s29_s14), 0  ;;  %s1272_s7 = scalar_lea.hbm %s1429_s3, %s769_s17 }
  0x45   : > { %s104_s11 = ssub.s32 %s1076_s22, %s1460_s14  ;;  %s234_s10 = scalar_lea.vmem [#allocation8], %s741_s9 }
  0x46   : > { %p105_p2 = scmp.eq.s32.totalorder %s104_s11, 0  ;;  %s241_s13 = sshll.u32 %s234_s10, 4  ;;  %s1276_s13 = int_to_ptr.vmem [resolvable:$true] %s241_s13 }
  0x47   : > { %s1444_s8 = sadd.s32 1, %s1068_s20  ;;  %s1283_s30 = scalar_lea.sflag [#allocation4], %s230_s15 }
  0x48   : > { %s1281_s26 = scalar_select %p105_p2, %s1068_s20, %s1444_s8  }
  0x49   : > { %s960_s16 = scalar_lea.hbm %s1272_s7, 1024  ;;  %p962_p9 = pneg %p1205_p4 }
  0x4a   : > { %p961_p8 = scmp.ne.s32.totalorder %s1272_s7, %s960_s16  ;;  %s965_s9 = scalar_lea.hbm %s1429_s3, 2048 }
  0x4b   : > { %p966_p5 = scmp.lt.u32.totalorder %s1272_s7, %s1429_s3  ;;  %p967_p1 = scmp.lt.u32.totalorder %s965_s9, %s960_s16 }
  0x4c   : > { %p963_p0 = pnand %p962_p9, %p961_p8  ;;  %p969_p11 = scmp.lt.u32.totalorder %s960_s16, %s1272_s7 }
  0x4d   : > { %p968_p6 = por %p967_p1, %p966_p5 }
  0x4e   : > { %p964_p13 = pneg %p963_p0 }
  0x4f   : > { %p970_p3 = por %p969_p11, %p968_p6 }
  0x51   : > { %p971_p7 = pnand %p970_p3, %p964_p13 }
  0x53   : > { %974 = shalt.err (!%p971_p7)
}
  0x54   : > { %s975_s15 = scalar_lea.vmem %s1276_s13, 1024  ;;  %s1086_s10 = smov [#allocation8]  }
  0x55   : > { %p976_p10 = scmp.ne.s32.totalorder %s1276_s13, %s975_s15  ;;  %s980_s8 = sshll.u32 %s1086_s10, 4  ;;  %s981_s8 = int_to_ptr.vmem [resolvable:$false] %s980_s8 }
  0x56   : > { %s982_s17 = scalar_lea.vmem %s981_s8, 2048  ;;  %p983_p0 = scmp.lt.s32.totalorder %s1276_s13, %s981_s8 }
  0x57   : > { %p978_p2 = pnand %p976_p10, %p962_p9  ;;  %p984_p5 = scmp.lt.s32.totalorder %s982_s17, %s975_s15 }
  0x59   : > { %p979_p8 = pneg %p978_p2  ;;  %p985_p1 = por %p984_p5, %p983_p0 }
  0x5b   : > { %p986_p6 = pnand %p985_p1, %p979_p8 }
  0x5d   : > { %989 = shalt.err (!%p986_p6)
}
  0x5e   : > { %s1087_s16 = smov 512   ;;  %s1088_s25 = smov 256  }
  0x5f   : > { %s1089_s9 = smov 16   ;;  %261 = sbr.rel (%p1187_p12) target bundleno = 611 (0x263), region = 40 }
  0x60   : > { %818 = dma.hbm_to_vmem [thread:$0]  (!%p1205_p4), %s1272_s7, 1024, %s1276_s13, %s1283_s30, %s1087_s16, %s1088_s25, %s1089_s9  }
  0x61   : > { %p1445_p9 = scmp.eq.s32.totalorder (!%p1187_p12), %s1156_s24, 0 }
  0x66   : > { %1043 = dma.done.wait (%p1445_p9), [#allocation4], 256   ;;  %p1446_p13 = pmov %p1445_p9 }
  0x67   : > { %p1447_p11 = pmov %p1445_p9 }
  0x68   : > { %1045 = vsyncadd (%p1446_p13), [#allocation4], 4294967040 }
  0x69   : > { %1047 = dma.done.wait (%p1447_p11), [#allocation7], 512   ;;  %p1448_p3 = pmov %p1445_p9 }
  0x6a   : > { %s271_s12 = sand.u32 1, %s1156_s24   ;;  %s273_s7 = sand.u32 1, %s1064_s19  }
  0x6b   : > { %1049 = vsyncadd (%p1448_p3), [#allocation7], 4294966784  ;;  %s747_s6 = sshll.u32 %s273_s7, 6  ;;  %s272_s13 = scalar_lea.sflag [#allocation4], %s271_s12 }
  0x6c   : > { %s1325_s30 = scalar_lea.vmem [#allocation8], %s747_s6  ;;  %p1449_p12 = scmp.ne.s32.totalorder %s1437_s28, 0 }
  0x6e   : > { %1051 = dma.done.wait (%p1449_p12), %s272_s13, 1024  }
  0x6f   : > { %1053 = vsyncadd (%p1449_p12), %s272_s13, 4294966272  ;;  %s749_s27 = sshll.u32 %s1072_s21, 2  ;;  %s1338_s10 = scalar_lea.vmem [#allocation9], %s747_s6 }
  0x70   : > { %p309_p4 = scmp.lt.s32.totalorder %s749_s27, 7  ;;  %p750_p7 = scmp.ne.s32.totalorder %s1072_s21, 0 }
  0x71   : > { %v322_v0 = vld [vmem:[#allocation6] sm:$0xff] (!%p750_p7)  ;;  %v323_v1 = vld [vmem:[#allocation6 + $0x8] sm:$0xff] (!%p750_p7)  ;;  %v324_v2 = vld [vmem:[#allocation6 + $0x10] sm:$0xff] (!%p750_p7)  ;;  %vm333_vm0 = vcmask (!%p750_p7), 261120  }
  0x72   : > { %s1462_s27 = smov (!%p309_p4, %s749_s27), 7  ;;  %319 = sbr.rel (%p750_p7) target bundleno = 368 (0x170), region = 56 }
  0x73   : > { %s311_s24 = scalar_lea.vmem %s1430_s4, %s1462_s27  ;;  %v788_v3 = vpack.c.bf16 (!%p750_p7), %v323_v1, %v322_v0  ;;  %v325_v4 = vld [vmem:[#allocation6 + $0x18] sm:$0xff] (!%p750_p7)  ;;  %v320_v5 = vld [vmem:[#allocation3] sm:$0xff] (!%p750_p7)  ;;  %v751_v8 = vld [vmem:[%s1428_s2] ss:$0 sm:$0xff] (!%p750_p7) }
  0x74   : > { %v792_v6 = vpack.c.bf16 (!%p750_p7), %v325_v4, %v324_v2  ;;  %785 = vmatprep.mubr.msk.f32.mxu0 (!%p750_p7), %vm333_vm0, %v320_v5  ;;  %v321_v7 = vld [vmem:[#allocation3 + $0x8] sm:$0xff] (!%p750_p7) }
  0x75   : > { %789 = vmatprep.subr.bf16.mxu0 (!%p750_p7), %v788_v3 }
  0x76   : > { %791 = vmatpush3.bf16.msra.mxu0 (!%p750_p7), %v788_v3 }
  0x77   : > { %793 = vmatprep.subr.bf16.mxu0 (!%p750_p7), %v792_v6 }
  0x7a   : > { %795 = vmatpush3.bf16.msra.mxu0 %v792_v6 }
  0x7d   : > { %786 = vmatmul.mubr.msk.f32.vlgmr.msra.gmra.mrb[0].mxu0 %vm333_vm0, %v321_v7 }
 0x150   : > { %v787_v9 = vpop.f32.mrb[0].mxu0 }
 0x151   : > { %v412_v10 = vadd.f32 %v787_v9, %v751_v8  ;;  %v406_v11 = vpop.f32.mrb[1].mxu0 }
 0x152   : > { %v407_v12 = vadd.f32 %v751_v8, %v406_v11 }
 0x153   : > { %v418_v13 = vmul.f32 0.044715, %v412_v10  ;;  %v416_v25 = vmul.f32 0.5, %v412_v10 }
 0x154   : > { %v417_v14 = vmul.f32 0.044715, %v407_v12  ;;  %v415_v27 = vmul.f32 0.5, %v407_v12 }
 0x155   : > { %v420_v15 = vmul.f32 %v418_v13, %v412_v10 }
 0x156   : > { %v419_v16 = vmul.f32 %v417_v14, %v407_v12 }
 0x157   : > { %v422_v17 = vmul.f32 %v420_v15, %v412_v10 }
 0x158   : > { %v421_v18 = vmul.f32 %v419_v16, %v407_v12 }
 0x159   : > { %v424_v19 = vadd.f32 %v422_v17, %v412_v10 }
 0x15a   : > { %v423_v20 = vadd.f32 %v421_v18, %v407_v12 }
 0x15b   : > { %v426_v21 = vmul.f32 0.7978846, %v424_v19 }
 0x15c   : > { %v425_v22 = vmul.f32 0.7978846, %v423_v20 }
 0x15d   : > { %888 = vtanh.f32 %v426_v21 }
 0x15e   : > { %890 = vtanh.f32 %v425_v22 }
 0x167   : > { %v889_v23 = vpop.eup %888 }
 0x168   : > { %v891_v24 = vpop.eup %890  ;;  %v430_v26 = vadd.f32 1.0, %v889_v23 }
 0x169   : > { %v429_v28 = vadd.f32 1.0, %v891_v24 }
 0x16a   : > { %v432_v29 = vmul.f32 %v430_v26, %v416_v25 }
 0x16b   : > { %v431_v30 = vmul.f32 %v429_v28, %v415_v27 }
 0x16d   : > { %v433_v31 = vpack.c.bf16 %v432_v29, %v431_v30 }
 0x16f   : > { %434 = vst.msk [vmem:[#allocation2] sm:$0xff] %vm333_vm0, %v433_v31 }
 0x170 PF: > { %v892_v32 = vld [vmem:[%s1325_s30 + $0x4] ss:$16 sps:$4 sm:$0xff]   ;;  %v894_v33 = vld [vmem:[%s1325_s30 + $0xc] ss:$16 sps:$4 sm:$0xff]   ;;  %v1090_v34 = vmov 0   ;;  %vm506_vm1 = vcmask 261120   ;;  %v446_v42 = vlaneseq }
 0x171   : > { %542 = vmatprep.mubr.bf16.mxu0 %v1090_v34  ;;  %585 = vmatprep.mubr.bf16.mxu1 %v1090_v34  ;;  %v896_v35 = vld [vmem:[%s1325_s30] ss:$16 sps:$4 sm:$0xff]   ;;  %v897_v36 = vld [vmem:[%s1325_s30 + $0x8] ss:$16 sps:$4 sm:$0xff]   ;;  %v898_v37 = vld [vmem:[%s1325_s30 + $0x24] ss:$16 sps:$4 sm:$0xff]  }
 0x172   : > { %510 = vmatprep.subr.bf16.mxu0 %v892_v32  ;;  %553 = vmatprep.subr.bf16.mxu1 %v894_v33  ;;  %v900_v38 = vld [vmem:[%s1325_s30 + $0x2c] ss:$16 sps:$4 sm:$0xff]   ;;  %v902_v39 = vld [vmem:[%s1325_s30 + $0x20] ss:$16 sps:$4 sm:$0xff]   ;;  %v903_v40 = vld [vmem:[%s1325_s30 + $0x28] ss:$16 sps:$4 sm:$0xff]  }
 0x173   : > { %511 = vmatpush1.bf16.msra.mxu0 %v896_v35  ;;  %554 = vmatpush1.bf16.msra.mxu1 %v897_v36  ;;  %v447_v43 = vshrl.u32 %v446_v42, 7  ;;  %v444_v46 = vld [vmem:[%s311_s24] sm:$0xf]  ;;  %s770_s25 = sshll.u32 %s1072_s21, 9  ;;  %s621_s9 = sshll.u32 %s1338_s10, 4  ;;  %s1369_s9 = int_to_ptr.vmem [resolvable:$true] %s621_s9 }
 0x174   : > { %512 = vmatprep.subr.bf16.mxu0 %v898_v37  ;;  %555 = vmatprep.subr.bf16.mxu1 %v900_v38  ;;  %s1365_s21 = scalar_lea.hbm %s1431_s5, %s770_s25  ;;  %s1379_s13 = scalar_lea.sflag [#allocation5], %s273_s7 }
 0x175   : > { %v448_v44 = vsub.s32 0, %v447_v43  ;;  %v456_v45 = vsub.s32 2, %v447_v43  ;;  %v452_v47 = vsub.s32 1, %v447_v43  ;;  %v460_v48 = vsub.s32 3, %v447_v43  ;;  %s990_s30 = scalar_lea.vmem %s1369_s9, 1024  ;;  %p1450_p2 = scmp.ne.s32.totalorder %s1438_s29, 0 }
 0x176   : > { %v435_v41 = vld [vmem:[#allocation2] sm:$0xff]  ;;  %p991_p10 = scmp.ne.s32.totalorder %s1369_s9, %s990_s30  ;;  %s1091_s27 = smov [#allocation9]  }
 0x177   : > { %513 = vmatpush1.bf16.msra.mxu0 %v902_v39  ;;  %556 = vmatpush1.bf16.msra.mxu1 %v903_v40  ;;  %v449_v49 = vrot.slane %v444_v46, %v448_v44  ;;  %v457_v50 = vrot.slane %v444_v46, %v456_v45  ;;  %v453_v51 = vrot.slane %v444_v46, %v452_v47  ;;  %s994_s11 = sshll.u32 %s1091_s27, 4  ;;  %s995_s11 = int_to_ptr.vmem [resolvable:$false] %s994_s11 }
 0x178   : > { %v461_v52 = vrot.slane %v444_v46, %v460_v48  ;;  %p992_p8 = pnand %p991_p10, %p1450_p2  ;;  %s996_s15 = scalar_lea.vmem %s995_s11, 2048 }
 0x179   : > { %p997_p5 = scmp.lt.s32.totalorder %s1369_s9, %s995_s11  ;;  %p998_p1 = scmp.lt.s32.totalorder %s996_s15, %s990_s30 }
 0x17a   : > { %762 = vmatmul.mubr.msk.bf16.vlgmr.msra.gmra.mrb[0].mxu0 %vm506_vm1, %v435_v41  ;;  %763 = vmatmul.mubr.msk.bf16.vlgmr.msra.gmra.mrb[0].mxu1 %vm506_vm1, %v435_v41  ;;  %p993_p0 = pneg %p992_p8 }
 0x17b   : > { %p999_p6 = por %p998_p1, %p997_p5 }
 0x17d   : > { %p1000_p9 = pnand %p999_p6, %p993_p0 }
 0x24d   : > { %v544_v53 = vpop.f32.mrb[0].mxu0  ;;  %v587_v54 = vpop.f32.mrb[0].mxu1 }
 0x24e   : > { %v545_v55 = vadd.f32 %v544_v53, %v449_v49  ;;  %v588_v56 = vadd.f32 %v587_v54, %v457_v50  ;;  %v546_v57 = vpop.f32.mrb[1].mxu0  ;;  %v589_v58 = vpop.f32.mrb[1].mxu1 }
 0x24f   : > { %v547_v59 = vadd.f32 %v546_v57, %v453_v51  ;;  %v590_v60 = vadd.f32 %v589_v58, %v461_v52  ;;  %v548_v61 = vpop.f32.mrb[2].mxu0  ;;  %v591_v62 = vpop.f32.mrb[2].mxu1 }
 0x250   : > { %596 = vst [vmem:[%s1338_s10] sm:$0xff] %v545_v55  ;;  %598 = vst [vmem:[%s1338_s10 + $0x10] sm:$0xff] %v588_v56  ;;  %v549_v63 = vadd.f32 %v548_v61, %v449_v49  ;;  %v592_v0 = vadd.f32 %v591_v62, %v457_v50  ;;  %v550_v1 = vpop.f32.mrb[3].mxu0  ;;  %v593_v2 = vpop.f32.mrb[3].mxu1 }
 0x251   : > { %597 = vst [vmem:[%s1338_s10 + $0x8] sm:$0xff] %v547_v59  ;;  %599 = vst [vmem:[%s1338_s10 + $0x18] sm:$0xff] %v590_v60  ;;  %v551_v3 = vadd.f32 %v550_v1, %v453_v51  ;;  %v594_v4 = vadd.f32 %v593_v2, %v461_v52 }
 0x252   : > { %600 = vst [vmem:[%s1338_s10 + $0x20] sm:$0xff] %v549_v63  ;;  %602 = vst [vmem:[%s1338_s10 + $0x30] sm:$0xff] %v592_v0 }
 0x253   : > { %601 = vst [vmem:[%s1338_s10 + $0x28] sm:$0xff] %v551_v3  ;;  %603 = vst [vmem:[%s1338_s10 + $0x38] sm:$0xff] %v594_v4 }
 0x254   : > { %1003 = shalt.err (!%p1000_p9)
}
 0x255   : > { %s1004_s7 = scalar_lea.hbm %s1365_s21, 1024  ;;  %s1008_s28 = scalar_lea.hbm %s1431_s5, 2048 }
 0x256   : > { %p1005_p13 = scmp.ne.s32.totalorder %s1365_s21, %s1004_s7  ;;  %p1009_p12 = scmp.lt.u32.totalorder %s1365_s21, %s1431_s5 }
 0x257   : > { %p1010_p4 = scmp.lt.u32.totalorder %s1008_s28, %s1004_s7  ;;  %p1012_p10 = scmp.lt.u32.totalorder %s1004_s7, %s1365_s21 }
 0x258   : > { %p1006_p11 = pnand %p1005_p13, %p1450_p2 }
 0x259   : > { %p1011_p7 = por %p1010_p4, %p1009_p12 }
 0x25a   : > { %p1007_p3 = pneg %p1006_p11 }
 0x25b   : > { %p1013_p8 = por %p1012_p10, %p1011_p7 }
 0x25d   : > { %p1014_p0 = pnand %p1013_p8, %p1007_p3 }
 0x25f   : > { %1017 = shalt.err (!%p1014_p0)
}
 0x260   : > { %s1092_s16 = smov 512   ;;  %s1093_s25 = smov 1024  }
 0x261   : > { %s1094_s12 = smov 32  }
 0x262   : > { %806 = dma.vmem_to_hbm [thread:$0]  (%p1450_p2), %s1369_s9, 1024, %s1365_s21, %s1379_s13, %s1092_s16, %s1093_s25, %s1094_s12  }
 0x263 PF: > { %s1451_s6 = sld [smem:[#allocation14_spill]]  ;;  %s636_s30 = sand.u32 1, %s1060_s18  }
 0x264   : > { %p1453_p1 = scmp.ge.s32.totalorder %s1080_s23, 2  ;;  %s637_s27 = scalar_lea.sflag [#allocation5], %s636_s30 }
 0x269   : > { %p1452_p5 = scmp.ne.s32.totalorder %s1451_s6, 0 }
 0x26b   : > { %p820_p6 = pnand %p1453_p1, %p1452_p5 }
 0x26d   : > { %1055 = dma.done.wait (!%p820_p6), %s637_s27, 1024  }
 0x26e   : > { %1057 = vsyncadd (!%p820_p6), %s637_s27, 4294966272  ;;  %s20_s23 = sadd.s32 1, %s1080_s23   ;;  %s1454_s18 = smov %s1064_s19 }
 0x26f   : > { %p17_p9 = scmp.ge.s32.totalorder %s20_s23, 4   ;;  %s1455_s19 = smov %s1068_s20 }
 0x270   : > { %s1456_s20 = smov %s1281_s26  ;;  %s1457_s21 = smov %s1076_s22 }
 0x271   : > { %s1458_s22 = smov %s1460_s14  ;;  %19 = sbr.rel (!%p17_p9) target bundleno = 6 (0x6), region = 100 }
 0x278   :  { %642 = vsyncpa [#allocation4], 1 }
 0x279   :  { %644 = vsyncpa [#allocation4 + $0x1], 1 }
 0x27a   :  { %645 = vsyncpa [#allocation7], 1 }
 0x27b   :  { %646 = vsyncpa [#allocation5], 1 }
 0x27c   :  { %648 = vsyncpa [#allocation5 + $0x1], 1 }

</bundles_post_ra>
